<compile_context>
chip_gen: v5e
topology: v5e:2x2
jax: 0.10.0
libtpu: 0.0.40
codegen_flags: <defaults>
</compile_context>

<pallas_src>
import jax
import jax.numpy as jnp
from jax.experimental import pallas as pl
from jax.experimental.pallas import tpu as pltpu  # noqa: F401  (TPU backend import)

SCALE = 2.0343017578125e-05
DROP_P = 0.3


def _softmax_qk(q):
    # q: (BH, S, D) f32 -> attention probs (BH, S, S) f32
    s = jnp.einsum("bqd,bkd->bqk", q, q,
                   preferred_element_type=jnp.float32) * SCALE
    m = jnp.max(s, axis=-1, keepdims=True)
    e = jnp.exp(s - m)
    denom = jnp.sum(e, axis=-1, keepdims=True)
    return e * (1.0 / denom)


def _sdpa_eval_kernel(q_ref, v_ref, o_ref):
    # q_ref: (BH, S, D), v_ref: (BH, S, Dv), o_ref: (BH, S, Dv)
    p = _softmax_qk(q_ref[...].astype(jnp.float32))
    out = jnp.einsum("bqk,bkd->bqd", p, v_ref[...].astype(jnp.float32),
                     preferred_element_type=jnp.float32)
    o_ref[...] = out.astype(o_ref.dtype)


def _sdpa_train_kernel(q_ref, v_ref, drop_ref, o_ref):
    # drop_ref: (BH, S, S) precomputed dropout factor (0 or 1/(1-p))
    p = _softmax_qk(q_ref[...].astype(jnp.float32)) * drop_ref[...]
    out = jnp.einsum("bqk,bkd->bqd", p, v_ref[...].astype(jnp.float32),
                     preferred_element_type=jnp.float32)
    o_ref[...] = out.astype(o_ref.dtype)


def sdpa_pallas(qk, x1, *, dropout_rng=None):
    """softmax(qk @ qk^T * SCALE) [-> dropout(p=0.3)] @ x1.

    qk : (B, H, S, D)  -- the fixed Q==K operand (self.mul_3 surrogate)
    x1 : (B, H, S, Dv) -- forward input (the `V` of the final matmul)
    dropout_rng: None -> eval mode (dropout = identity);
                 PRNGKey -> train mode (inverted dropout, p=0.3)
    """
    B, H, S, Dk = qk.shape
    Bv, Hv, Sv, Dv = x1.shape
    assert (B, H, S) == (Bv, Hv, Sv)
    BH = B * H

    qk2 = qk.reshape(BH, S, Dk)
    v2 = x1.reshape(BH, S, Dv)
    out_shape = jax.ShapeDtypeStruct((BH, S, Dv), x1.dtype)

    if dropout_rng is None:
        out = pl.pallas_call(_sdpa_eval_kernel, out_shape=out_shape)(qk2, v2)
    else:
        keep = jax.random.bernoulli(dropout_rng, 1.0 - DROP_P, (BH, S, S))
        factor = keep.astype(jnp.float32) * (1.0 / (1.0 - DROP_P))
        out = pl.pallas_call(_sdpa_train_kernel, out_shape=out_shape)(qk2, v2, factor)

    return out.reshape(B, H, S, Dv)


if __name__ == "__main__":
    key = jax.random.PRNGKey(0)
    k1, k2, k3 = jax.random.split(key, 3)

    # Deterministic "parameter" playing the role of self.mul_3 (Q == K operand);
    # x1 is the forward input, shaped like torch.randn(1, 2, 4, 4).
    qk = jax.random.normal(k1, (1, 2, 4, 4), dtype=jnp.float32)
    x1 = jax.random.normal(k2, (1, 2, 4, 4), dtype=jnp.float32)

    # Eval mode (dropout = identity): verify against a pure-JAX reference.
    out_eval = jax.block_until_ready(sdpa_pallas(qk, x1))
    s_ref = jnp.einsum("bhsd,bhtd->bhst", qk, qk) * SCALE
    p_ref = jax.nn.softmax(s_ref, axis=-1)
    ref_eval = jnp.einsum("bhst,bhtd->bhsd", p_ref, x1)
    assert out_eval.shape == ref_eval.shape
    assert jnp.allclose(out_eval, ref_eval, atol=1e-5, rtol=1e-5), "eval mismatch"

    # Train mode (dropout p=0.3, mask generated outside the kernel): verify against a
    # pure-JAX reference using the identical mask.
    out_train = jax.block_until_ready(sdpa_pallas(qk, x1, dropout_rng=k3))
    B, H, S, _ = qk.shape
    keep = jax.random.bernoulli(k3, 1.0 - DROP_P, (B * H, S, S))
    factor = (keep.astype(jnp.float32) * (1.0 / (1.0 - DROP_P))).reshape(B, H, S, S)
    ref_train = jnp.einsum("bhst,bhtd->bhsd", p_ref * factor, x1)
    assert out_train.shape == (1, 2, 4, 4)
    assert jnp.allclose(out_train, ref_train, atol=1e-5, rtol=1e-5), "train mismatch"

    print("KERNEL_OK")
</pallas_src>

<mosaic_0001>
module attributes {stable_mosaic.version = 11 : i64} {
  func.func @_sdpa_eval_kernel(%arg0: memref<2x4x4xf32, #tpu.memory_space<vmem>>, %arg1: memref<2x4x4xf32, #tpu.memory_space<vmem>>, %arg2: memref<2x4x4xf32, #tpu.memory_space<vmem>>) attributes {dimension_semantics = [], scalar_prefetch = 0 : i64, scratch_operands = 0 : i64, tpu.core_type = #tpu.core_type<tc>} {
    %c0 = arith.constant 0 : index
    %c0_0 = arith.constant 0 : index
    %c0_1 = arith.constant 0 : index
    %0 = vector.load %arg0[%c0, %c0_0, %c0_1] : memref<2x4x4xf32, #tpu.memory_space<vmem>>, vector<2x4x4xf32>
    "tpu.trace_start"() <{level = 10 : i32, message = "bqd,bkd->bqk"}> : () -> ()
    %cst = arith.constant dense<0.000000e+00> : vector<2x4x4xf32>
    %1 = tpu.matmul %0, %0, %cst {dimension_numbers = #tpu.dot_dimension_numbers<[2], [2], [1], [1], [0, 0, 0, 1, 1, 1], [0], [0]>} : vector<2x4x4xf32>, vector<2x4x4xf32>, vector<2x4x4xf32> -> vector<2x4x4xf32>
    "tpu.trace_stop"() : () -> ()
    %cst_2 = arith.constant 2.03430172E-5 : f32
    %2 = vector.broadcast %cst_2 : f32 to vector<2x4x4xf32>
    %3 = arith.mulf %1, %2 : vector<2x4x4xf32>
    %cst_3 = arith.constant dense<0xFF800000> : vector<2x4xf32>
    %4 = vector.multi_reduction <maximumf>, %3, %cst_3 [2] : vector<2x4x4xf32> to vector<2x4xf32>
    %5 = vector.shape_cast %4 : vector<2x4xf32> to vector<2x4x1xf32>
    %6 = vector.broadcast %5 : vector<2x4x1xf32> to vector<2x4x4xf32>
    %7 = arith.subf %3, %6 : vector<2x4x4xf32>
    %8 = math.exp %7 : vector<2x4x4xf32>
    %cst_4 = arith.constant dense<0.000000e+00> : vector<2x4xf32>
    %9 = vector.multi_reduction <add>, %8, %cst_4 [2] : vector<2x4x4xf32> to vector<2x4xf32>
    %10 = vector.shape_cast %9 : vector<2x4xf32> to vector<2x4x1xf32>
    %cst_5 = arith.constant 1.000000e+00 : f32
    %11 = vector.broadcast %cst_5 : f32 to vector<2x4x1xf32>
    %12 = arith.divf %11, %10 : vector<2x4x1xf32>
    %13 = vector.broadcast %12 : vector<2x4x1xf32> to vector<2x4x4xf32>
    %14 = arith.mulf %8, %13 : vector<2x4x4xf32>
    %c0_6 = arith.constant 0 : index
    %c0_7 = arith.constant 0 : index
    %c0_8 = arith.constant 0 : index
    %15 = vector.load %arg1[%c0_6, %c0_7, %c0_8] : memref<2x4x4xf32, #tpu.memory_space<vmem>>, vector<2x4x4xf32>
    "tpu.trace_start"() <{level = 10 : i32, message = "bqk,bkd->bqd"}> : () -> ()
    %cst_9 = arith.constant dense<0.000000e+00> : vector<2x4x4xf32>
    %16 = tpu.matmul %14, %15, %cst_9 {dimension_numbers = #tpu.dot_dimension_numbers<[2], [1], [1], [2], [0, 0, 0, 1, 1, 2], [0], [0]>} : vector<2x4x4xf32>, vector<2x4x4xf32>, vector<2x4x4xf32> -> vector<2x4x4xf32>
    "tpu.trace_stop"() : () -> ()
    %c0_10 = arith.constant 0 : index
    %c0_11 = arith.constant 0 : index
    %c0_12 = arith.constant 0 : index
    %17 = vector.load %arg2[%c0_10, %c0_11, %c0_12] : memref<2x4x4xf32, #tpu.memory_space<vmem>>, vector<2x4x4xf32>
    tpu.vector_store %arg2[%c0_10, %c0_11, %c0_12], %16 {strides = array<i32>} : memref<2x4x4xf32, #tpu.memory_space<vmem>>, vector<2x4x4xf32>,
    return
  }
}

</mosaic_0001>

<bundles_post_ra>
// kernel: tpu_custom_call.1
= control target key start
LH: loop header
LB: loop body
LE: loop exit
PB: predicated region body
PF: predicated region fallthrough
CT: control target
= control target key end

     0   :  { %7 = vsyncpa [#allocation3], 0  ;;  %s372_s0 = inlined_call_operand.hbm [shape: f32[2,4,4], index: 0, kind: input, shape index: {}]   ;;  %s373_s1 = inlined_call_operand.hbm [shape: f32[2,4,4], index: 1, kind: input, shape index: {}]   ;;  %s374_s2 = inlined_call_operand.hbm [shape: f32[2,4,4], index: 2, kind: output, shape index: {}]  }
   0x1   :  { %8 = vsyncpa [#allocation6], 0 }
   0x2   :  { %9 = vsyncpa [#allocation4], 0  ;;  %s14_s11 = sshll.u32 %s372_s0, 4  ;;  %s322_s12 = smov [#allocation2]   ;;  %s15_s11 = int_to_ptr.hbm [resolvable:$true] %s14_s11 }
   0x3   :  { %s16_s13 = sshll.u32 %s322_s12, 4  ;;  %s27_s16 = sshll.u32 %s373_s1, 4  ;;  %s17_s13 = int_to_ptr.vmem [resolvable:$true] %s16_s13  ;;  %s28_s16 = int_to_ptr.hbm [resolvable:$true] %s27_s16 }
   0x4   :  { %s323_s17 = smov 64   ;;  %s324_s18 = smov 4  }
   0x5   :  { %22 = dma.hbm_to_vmem [thread:$0]  %s15_s11, 128, %s17_s13, [#allocation3], %s323_s17, %s323_s17, %s324_s18  }
   0x6   :  { %s325_s19 = smov [#allocation5]  }
   0x7   :  { %s29_s20 = sshll.u32 %s325_s19, 4  ;;  %s30_s20 = int_to_ptr.vmem [resolvable:$true] %s29_s20 }
   0x8   :  { %35 = dma.hbm_to_vmem [thread:$0]  %s28_s16, 128, %s30_s20, [#allocation6], %s323_s17, %s323_s17, %s324_s18  }
   0x9   :  { %316 = dma.done.wait [#allocation3], 128  }
   0xa   :  { %317 = vsyncadd [#allocation3], 4294967168 }
   0xb   :  { %318 = dma.done.wait [#allocation6], 128  }
   0xc   :  { %319 = vsyncadd [#allocation6], 4294967168  ;;  %vm46_vm0 = vcmask 31744   ;;  %v44_v0 = vld [vmem:[#allocation2] sm:$0xf]  ;;  %vm95_vm1 = vcmask 27648  }
   0xd   :  { %v45_v1 = vld [vmem:[#allocation2 + $0x4] sm:$0xf]  ;;  %223 = vmatpush.xpose.msk.msra.mxu0 %vm46_vm0, %v44_v0  ;;  %v146_v18 = vld [vmem:[#allocation5] sm:$0xf]  ;;  %vm151_vm2 = vcmask 1043456   ;;  %s326_s0 = smov [#allocation7]  }
   0xe   :  { %225 = vmatpush.xpose.msk.msra.mxu1 %vm46_vm0, %v45_v1  ;;  %227 = vmatpush.msk.msra.mxu2 %vm151_vm2, %v146_v18  ;;  %v147_v19 = vld [vmem:[#allocation5 + $0x4] sm:$0xf]  ;;  %s207_s1 = sshll.u32 %s326_s0, 4  ;;  %s209_s23 = sshll.u32 %s374_s2, 4  ;;  %s208_s1 = int_to_ptr.vmem [resolvable:$true] %s207_s1  ;;  %s210_s23 = int_to_ptr.hbm [resolvable:$true] %s209_s23 }
   0xf   :  { %229 = vmatpush.msk.msra.mxu3 %vm151_vm2, %v147_v19 }
  0x10   :  { %224 = vmatmul.msk.f32.vlgmr.msra.gmra.mxu0 %vm46_vm0, %v44_v0 }
  0x11   :  { %226 = vmatmul.msk.f32.vlgmr.msra.gmra.mxu1 %vm46_vm0, %v45_v1 }
  0x8d   :  { %v67_v2 = vpop.f32.mrf.mxu0 }
  0x8e   :  { %v93_v3 = vmul.f32 2.0343017e-05, %v67_v2  ;;  %v90_v4 = vpop.f32.mrf.mxu1 }
  0x8f   :  { %v94_v6 = vmul.f32 2.0343017e-05, %v90_v4 }
  0x90   :  { %v96_v5 = vsel %vm95_vm1, %v93_v3, -inf }
  0x91   :  { %97 = vmax.xlane.f32.xlu0 %v96_v5  ;;  %v99_v7 = vsel %vm95_vm1, %v94_v6, -inf }
  0x99   :  { %100 = vmax.xlane.f32.xlu0 %v99_v7 }
 0x104   :  { %v98_v8 = vpop.xlane.xlu0 %97 }
 0x105   :  { %v102_v9 = vsub.f32 %v93_v3, %v98_v8 }
 0x107   :  { %v104_v10 = vmul.f32 1.442695, %v102_v9 }
 0x109   :  { %236 = vpow2.f32 %v104_v10 }
 0x10c   :  { %v101_v11 = vpop.xlane.xlu0 %100 }
 0x10d   :  { %v103_v12 = vsub.f32 %v94_v6, %v101_v11 }
 0x10f   :  { %v237_v13 = vpop.eup %236  ;;  %v106_v14 = vmul.f32 1.442695, %v103_v12 }
 0x110   :  { %v108_v15 = vsel %vm95_vm1, %v237_v13, 0.0 }
 0x111   :  { %238 = vpow2.f32 %v106_v14  ;;  %109 = vadd.xlane.f32.xlu1 %v108_v15 }
 0x117   :  { %v239_v16 = vpop.eup %238 }
 0x118   :  { %v111_v17 = vsel %vm95_vm1, %v239_v16, 0.0 }
 0x119   :  { %112 = vadd.xlane.f32.xlu1 %v111_v17 }
 0x184   :  { %v110_v20 = vpop.xlane.xlu1 %109 }
 0x185   :  { %240 = vrcp.f32 %v110_v20  ;;  %v125_v25 = vand.u32 2147483648, %v110_v20  ;;  %v123_v27 = vand.u32 2147483647, %v110_v20  ;;  %vm119_vm4 = vweird.f32 %v110_v20 }
 0x187   :  { %v126_v30 = vor.u32 1.1754944e-38, %v125_v25  ;;  %vm124_vm6 = vcmp.eq.f32.partialorder %v123_v27, 8.507059e+37 }
 0x18b   :  { %v241_v21 = vpop.eup %240 }
 0x18c   :  { %v115_v22 = vmul.f32 %v241_v21, %v110_v20  ;;  %v113_v23 = vpop.xlane.xlu1 %112  ;;  %vm120_vm3 = vweird.f32 %v241_v21 }
 0x18d   :  { %242 = vrcp.f32 %v113_v23  ;;  %vm121_vm5 = vmor %vm119_vm4, %vm120_vm3  ;;  %v140_v36 = vand.u32 2147483648, %v113_v23  ;;  %v138_v38 = vand.u32 2147483647, %v113_v23  ;;  %vm134_vm8 = vweird.f32 %v113_v23 }
 0x18e   :  { %v116_v24 = vsub.f32 1.0, %v115_v22 }
 0x18f   :  { %v141_v40 = vor.u32 1.1754944e-38, %v140_v36  ;;  %vm139_vm10 = vcmp.eq.f32.partialorder %v138_v38, 8.507059e+37 }
 0x190   :  { %v117_v26 = vmul.f32 %v241_v21, %v116_v24 }
 0x192   :  { %v118_v28 = vadd.f32 %v241_v21, %v117_v26 }
 0x193   :  { %v243_v29 = vpop.eup %242 }
 0x194   :  { %v130_v31 = vmul.f32 %v243_v29, %v113_v23  ;;  %v122_v32 = vsel %vm121_vm5, %v241_v21, %v118_v28  ;;  %vm135_vm7 = vweird.f32 %v243_v29 }
 0x195   :  { %v127_v33 = vsel %vm124_vm6, %v126_v30, %v122_v32  ;;  %vm136_vm9 = vmor %vm134_vm8, %vm135_vm7 }
 0x196   :  { %v131_v34 = vsub.f32 1.0, %v130_v31  ;;  %v144_v35 = vmul.f32 %v237_v13, %v127_v33 }
 0x198   :  { %v132_v37 = vmul.f32 %v243_v29, %v131_v34  ;;  %228 = vmatmul.msk.f32.vlgmr.msra.gmra.mxu2 %vm46_vm0, %v144_v35 }
 0x19a   :  { %v133_v39 = vadd.f32 %v243_v29, %v132_v37 }
 0x19c   :  { %v137_v41 = vsel %vm136_vm9, %v243_v29, %v133_v39 }
 0x19d   :  { %v142_v42 = vsel %vm139_vm10, %v141_v40, %v137_v41 }
 0x19e   :  { %v145_v43 = vmul.f32 %v239_v16, %v142_v42 }
 0x1a0   :  { %230 = vmatmul.msk.f32.vlgmr.msra.gmra.mxu3 %vm46_vm0, %v145_v43 }
 0x21b   :  { %v172_v44 = vpop.f32.mrf.mxu2 }
 0x21c   :  { %201 = vst.msk [vmem:[#allocation7] sm:$0xf] %vm95_vm1, %v172_v44 }
 0x223   :  { %v198_v45 = vpop.f32.mrf.mxu3 }
 0x224   :  { %202 = vst.msk [vmem:[#allocation7 + $0x4] sm:$0xf] %vm95_vm1, %v198_v45 }
 0x225   :  { %215 = dma.vmem_to_hbm [thread:$0]  %s208_s1, 128, %s210_s23, [#allocation4], %s323_s17, %s323_s17, %s324_s18  }
 0x226   :  { %320 = dma.done.wait [#allocation4], 128  }
 0x227   :  { %321 = vsyncadd [#allocation4], 4294967168 }
 0x228   :  { %220 = vsyncpa [#allocation3], 1 }
 0x229   :  { %221 = vsyncpa [#allocation6], 1 }
 0x22a   :  { %222 = vsyncpa [#allocation4], 1 }

</bundles_post_ra>
